<compile_context>
chip_gen: v7x
topology: tpu7x:2x2x1
jax: 0.10.0
libtpu: 0.0.40
codegen_flags: <defaults>
</compile_context>

<pallas_src>
import jax
import jax.numpy as jnp
from jax.experimental import pallas as pl
from jax.experimental.pallas import tpu as pltpu


def _round_up(v, m):
    return (v + m - 1) // m * m


# ---------------------------------------------------------------------------
# Fused kernel: the whole SAGE stack in one invocation.  All operands are a
# single full-array VMEM block; activations never leave VMEM.
#   a_ref : [Np, Np]        bf16   row-normalized adjacency
#   x_ref : [Np, Fp]        bf16   input node features
#   w_ref : [L,  Fp, 2*Fp]  bf16   per layer [Wl | Wr] (transposed vs torch)
#   b_ref : [8,  Fp]        f32    per layer bias (rows 0..L-1 used)
#   o_ref : [Np, Fp]        f32    last-layer activations
# ---------------------------------------------------------------------------
def _sage_cox_fused_kernel(a_ref, x_ref, w_ref, b_ref, o_ref):
    num_layers = w_ref.shape[0]
    f_p = x_ref.shape[1]

    a = a_ref[...]                         # bf16 MXU operand, resident all layers
    biases = b_ref[...]                    # f32 [8, Fp]
    h16 = x_ref[...]                       # bf16 activations
    h = None
    for layer in range(num_layers):        # static unroll (4 layers)
        # One wide matmul per layer: cat = [h @ Wl | h @ Wr], f32 accumulation.
        cat = jnp.dot(h16, w_ref[layer], preferred_element_type=jnp.float32)
        # Neighbor path: project first (above), then aggregate with A.
        neigh = jnp.dot(a, cat[:, :f_p].astype(jnp.bfloat16),
                        preferred_element_type=jnp.float32)
        # Root path + bias, f32 epilogue.
        h = neigh + cat[:, f_p:] + biases[layer]
        h16 = h.astype(jnp.bfloat16)
    o_ref[...] = h


def _full_spec(shape):
    zeros = (0,) * len(shape)
    return pl.BlockSpec(shape, lambda i, _z=zeros: _z)


# ---------------------------------------------------------------------------
# Wrapper: pad to TPU-friendly shapes, pack weights, single pallas_call.
# ---------------------------------------------------------------------------
def sage_cox_fused(a_norm, x, params):
    """a_norm: [N, N] row-normalized adjacency (f32); x: [N, F0] (f32);
    params: list of (w_l [Fi,Fo], w_r [Fi,Fo], b [1,Fo]).  Returns [N, F_last]."""
    n, f0 = x.shape
    num_layers = len(params)
    f_dims = [f0] + [w_l.shape[1] for (w_l, _, _) in params]
    f_p = _round_up(max(f_dims), 128)          # one lane-dense feature width
    n_p = _round_up(n, 128)                    # lane/sublane-dense node count

    # bf16 operands built host-side (halves DMA bytes; no in-kernel converts).
    a_p = jnp.zeros((n_p, n_p), jnp.bfloat16).at[:n, :n].set(
        a_norm.astype(jnp.bfloat16))
    x_p = jnp.zeros((n_p, f_p), jnp.bfloat16).at[:n, :f0].set(
        x.astype(jnp.bfloat16))

    # Packed weight slab: layer l stores [Wl | Wr] in one [Fp, 2*Fp] tile.
    w_slab = jnp.zeros((num_layers, f_p, 2 * f_p), jnp.bfloat16)
    b_slab = jnp.zeros((_round_up(num_layers, 8), f_p), jnp.float32)
    for l, (w_l, w_r, b) in enumerate(params):
        fi, fo = w_l.shape
        w_slab = w_slab.at[l, :fi, :fo].set(w_l.astype(jnp.bfloat16))
        w_slab = w_slab.at[l, :fi, f_p:f_p + fo].set(w_r.astype(jnp.bfloat16))
        b_slab = b_slab.at[l, :fo].set(jnp.reshape(b, (-1,)))
    f_last = params[-1][0].shape[1]

    # Cost / VMEM budgets from actual padded buffer sizes (+20% headroom for
    # double-buffered DMAs and live f32 intermediates).
    flops = num_layers * (2 * n_p * f_p * (2 * f_p) + 2 * n_p * n_p * f_p)
    in_bytes = (a_p.size + x_p.size + w_slab.size) * 2 + b_slab.size * 4
    out_bytes = n_p * f_p * 4
    activ_bytes = n_p * (2 * f_p) * 4 + 3 * n_p * f_p * 4 + n_p * n_p * 2
    vmem_limit = max(int(1.2 * (2 * (in_bytes + out_bytes) + activ_bytes)),
                     4 * 1024 * 1024)
    # TODO(synk): once padded buffers approach ~48 MiB (v7x has 64 MiB VMEM per
    # TC), tile rows of A/h/out over a ("parallel", ...) grid so both v7x
    # TensorCores are used; for E << N^2 replace the dense A @ proj aggregation
    # with a scalar-prefetch gather / segment-sum path (O(E*F)).

    out_p = pl.pallas_call(
        _sage_cox_fused_kernel,
        out_shape=jax.ShapeDtypeStruct((n_p, f_p), jnp.float32),
        grid=(1,),
        in_specs=[_full_spec(a_p.shape), _full_spec(x_p.shape),
                  _full_spec(w_slab.shape), _full_spec(b_slab.shape)],
        out_specs=_full_spec((n_p, f_p)),
        compiler_params=pltpu.CompilerParams(
            dimension_semantics=("arbitrary",),
            vmem_limit_bytes=vmem_limit),
        cost_estimate=pl.CostEstimate(
            flops=int(flops),
            transcendentals=0,
            bytes_accessed=int(in_bytes + out_bytes)),
    )(a_p, x_p, w_slab, b_slab)

    return out_p[:n, :f_last]


# ---------------------------------------------------------------------------
# Glue: dense normalized adjacency from edge_index (mean aggregation).
# Built once per graph and cached by the caller (edge_index is static).
# ---------------------------------------------------------------------------
def build_mean_adjacency(edge_index, num_nodes):
    src = edge_index[0]
    dst = edge_index[1]
    adj = jnp.zeros((num_nodes, num_nodes), jnp.float32)
    adj = adj.at[dst, src].add(1.0)                 # A[dst, src] += multiplicity
    in_deg = jnp.sum(adj, axis=1, keepdims=True)
    # Nodes with no incoming edges aggregate to 0 (matches PyG mean aggr).
    return adj / jnp.maximum(in_deg, 1.0)


# ---------------------------------------------------------------------------
# Parameter construction (deterministic, __init__ shapes for num_layers=4).
# Weights stored [F_in, F_out] (transposed vs torch's [out, in]).
# ---------------------------------------------------------------------------
def make_params(key, in_channels, num_layers=4):
    assert num_layers == 4
    n1 = int(in_channels * (2 / 3))
    n2 = int(n1 * (2 / 3))
    n3 = int(n2 / 2)
    dims = [(in_channels, n1), (n1, n2), (n2, n3), (n3, 1)]
    params = []
    for (fi, fo) in dims:
        key, k1, k2, k3 = jax.random.split(key, 4)
        scale = 1.0 / jnp.sqrt(jnp.float32(fi))
        w_l = jax.random.uniform(k1, (fi, fo), jnp.float32, -scale, scale)
        w_r = jax.random.uniform(k2, (fi, fo), jnp.float32, -scale, scale)
        b = jax.random.uniform(k3, (1, fo), jnp.float32, -scale, scale)
        params.append((w_l, w_r, b))
    return params


# ---------------------------------------------------------------------------
# SageCox forward (num_layers=4; self._flag == 1 -> output.view(-1)).
# A is a cached per-graph argument (adjacency built outside the hot path).
# ---------------------------------------------------------------------------
@jax.jit
def sage_cox_forward(a_norm, x, params):
    out = sage_cox_fused(a_norm, x, params)
    return out.reshape(-1)


if __name__ == "__main__":
    key = jax.random.PRNGKey(0)

    N = 16            # number of nodes (samples)
    C = 32            # in_channels = X.shape[1] (features per node)
    E = 48            # number of edges

    k_x, k_src, k_dst, k_params = jax.random.split(key, 4)

    # Raw expression-like data, then the script-level preprocessing X = log2(X+1).
    x_raw = jax.random.uniform(k_x, (N, C), jnp.float32, 0.0, 100.0)
    x = jnp.log2(x_raw + 1.0)

    src = jax.random.randint(k_src, (E,), 0, N)
    dst = jax.random.randint(k_dst, (E,), 0, N)
    edge_index = jnp.stack([src, dst], axis=0).astype(jnp.int32)

    params = make_params(k_params, C, num_layers=4)

    # Adjacency built once per graph (cached), not inside the per-forward jit.
    a_norm = build_mean_adjacency(edge_index, N)
    jax.block_until_ready(a_norm)

    out = sage_cox_forward(a_norm, x, params)
    jax.block_until_ready(out)

    assert out.shape == (N,), out.shape
    print("KERNEL_OK")
</pallas_src>

<mosaic_0001>
module attributes {stable_mosaic.version = 11 : i64} {
  func.func @_sage_cox_fused_kernel(%arg0: i32, %arg1: memref<128x128xbf16, #tpu.memory_space<vmem>>, %arg2: memref<128x128xbf16, #tpu.memory_space<vmem>>, %arg3: memref<4x128x256xbf16, #tpu.memory_space<vmem>>, %arg4: memref<8x128xf32, #tpu.memory_space<vmem>>, %arg5: memref<128x128xf32, #tpu.memory_space<vmem>>) attributes {dimension_semantics = [#tpu.dimension_semantics<arbitrary>], iteration_bounds = array<i64: 1>, scalar_prefetch = 0 : i64, scratch_operands = 0 : i64, tpu.core_type = #tpu.core_type<tc>, window_params = [{pipeline_mode = #tpu.pipeline_mode<synchronous>, transform_indices = @transform_0, window_bounds = array<i64: 128, 128>}, {pipeline_mode = #tpu.pipeline_mode<synchronous>, transform_indices = @transform_1, window_bounds = array<i64: 128, 128>}, {pipeline_mode = #tpu.pipeline_mode<synchronous>, transform_indices = @transform_2, window_bounds = array<i64: 4, 128, 256>}, {pipeline_mode = #tpu.pipeline_mode<synchronous>, transform_indices = @transform_3, window_bounds = array<i64: 8, 128>}, {pipeline_mode = #tpu.pipeline_mode<synchronous>, transform_indices = @transform_4, window_bounds = array<i64: 128, 128>}]} {
    %c0 = arith.constant 0 : index
    %c0_0 = arith.constant 0 : index
    %0 = vector.load %arg1[%c0, %c0_0] : memref<128x128xbf16, #tpu.memory_space<vmem>>, vector<128x128xbf16>
    %c0_1 = arith.constant 0 : index
    %c0_2 = arith.constant 0 : index
    %1 = vector.load %arg4[%c0_1, %c0_2] : memref<8x128xf32, #tpu.memory_space<vmem>>, vector<8x128xf32>
    %c0_3 = arith.constant 0 : index
    %c0_4 = arith.constant 0 : index
    %2 = vector.load %arg2[%c0_3, %c0_4] : memref<128x128xbf16, #tpu.memory_space<vmem>>, vector<128x128xbf16>
    %c0_5 = arith.constant 0 : index
    %c0_6 = arith.constant 0 : index
    %c0_7 = arith.constant 0 : index
    %3 = vector.load %arg3[%c0_5, %c0_6, %c0_7] : memref<4x128x256xbf16, #tpu.memory_space<vmem>>, vector<1x128x256xbf16>
    %4 = vector.shape_cast %3 : vector<1x128x256xbf16> to vector<128x256xbf16>
    %cst = arith.constant dense<0.000000e+00> : vector<128x256xf32>
    %5 = tpu.matmul %2, %4, %cst {dimension_numbers = #tpu.dot_dimension_numbers<[1], [0], [0], [1], [0, 0, 1, 1], [], []>} : vector<128x128xbf16>, vector<128x256xbf16>, vector<128x256xf32> -> vector<128x256xf32>
    %6 = vector.extract_strided_slice %5 {offsets = [0, 0], sizes = [128, 128], strides = [1, 1]} : vector<128x256xf32> to vector<128x128xf32>
    %7 = arith.truncf %6 : vector<128x128xf32> to vector<128x128xbf16>
    %cst_8 = arith.constant dense<0.000000e+00> : vector<128x128xf32>
    %8 = tpu.matmul %0, %7, %cst_8 {dimension_numbers = #tpu.dot_dimension_numbers<[1], [0], [0], [1], [0, 0, 1, 1], [], []>} : vector<128x128xbf16>, vector<128x128xbf16>, vector<128x128xf32> -> vector<128x128xf32>
    %9 = vector.extract_strided_slice %5 {offsets = [0, 128], sizes = [128, 128], strides = [1, 1]} : vector<128x256xf32> to vector<128x128xf32>
    %10 = arith.addf %8, %9 : vector<128x128xf32>
    %11 = vector.extract_strided_slice %1 {offsets = [0, 0], sizes = [1, 128], strides = [1, 1]} : vector<8x128xf32> to vector<1x128xf32>
    %12 = vector.shape_cast %11 : vector<1x128xf32> to vector<128xf32>
    %13 = vector.shape_cast %12 : vector<128xf32> to vector<1x128xf32>
    %14 = vector.broadcast %13 : vector<1x128xf32> to vector<128x128xf32>
    %15 = arith.addf %10, %14 : vector<128x128xf32>
    %16 = arith.truncf %15 : vector<128x128xf32> to vector<128x128xbf16>
    %c1 = arith.constant 1 : index
    %c0_9 = arith.constant 0 : index
    %c0_10 = arith.constant 0 : index
    %17 = vector.load %arg3[%c1, %c0_9, %c0_10] : memref<4x128x256xbf16, #tpu.memory_space<vmem>>, vector<1x128x256xbf16>
    %18 = vector.shape_cast %17 : vector<1x128x256xbf16> to vector<128x256xbf16>
    %cst_11 = arith.constant dense<0.000000e+00> : vector<128x256xf32>
    %19 = tpu.matmul %16, %18, %cst_11 {dimension_numbers = #tpu.dot_dimension_numbers<[1], [0], [0], [1], [0, 0, 1, 1], [], []>} : vector<128x128xbf16>, vector<128x256xbf16>, vector<128x256xf32> -> vector<128x256xf32>
    %20 = vector.extract_strided_slice %19 {offsets = [0, 0], sizes = [128, 128], strides = [1, 1]} : vector<128x256xf32> to vector<128x128xf32>
    %21 = arith.truncf %20 : vector<128x128xf32> to vector<128x128xbf16>
    %cst_12 = arith.constant dense<0.000000e+00> : vector<128x128xf32>
    %22 = tpu.matmul %0, %21, %cst_12 {dimension_numbers = #tpu.dot_dimension_numbers<[1], [0], [0], [1], [0, 0, 1, 1], [], []>} : vector<128x128xbf16>, vector<128x128xbf16>, vector<128x128xf32> -> vector<128x128xf32>
    %23 = vector.extract_strided_slice %19 {offsets = [0, 128], sizes = [128, 128], strides = [1, 1]} : vector<128x256xf32> to vector<128x128xf32>
    %24 = arith.addf %22, %23 : vector<128x128xf32>
    %25 = vector.extract_strided_slice %1 {offsets = [1, 0], sizes = [1, 128], strides = [1, 1]} : vector<8x128xf32> to vector<1x128xf32>
    %26 = vector.shape_cast %25 : vector<1x128xf32> to vector<128xf32>
    %27 = vector.shape_cast %26 : vector<128xf32> to vector<1x128xf32>
    %28 = vector.broadcast %27 : vector<1x128xf32> to vector<128x128xf32>
    %29 = arith.addf %24, %28 : vector<128x128xf32>
    %30 = arith.truncf %29 : vector<128x128xf32> to vector<128x128xbf16>
    %c2 = arith.constant 2 : index
    %c0_13 = arith.constant 0 : index
    %c0_14 = arith.constant 0 : index
    %31 = vector.load %arg3[%c2, %c0_13, %c0_14] : memref<4x128x256xbf16, #tpu.memory_space<vmem>>, vector<1x128x256xbf16>
    %32 = vector.shape_cast %31 : vector<1x128x256xbf16> to vector<128x256xbf16>
    %cst_15 = arith.constant dense<0.000000e+00> : vector<128x256xf32>
    %33 = tpu.matmul %30, %32, %cst_15 {dimension_numbers = #tpu.dot_dimension_numbers<[1], [0], [0], [1], [0, 0, 1, 1], [], []>} : vector<128x128xbf16>, vector<128x256xbf16>, vector<128x256xf32> -> vector<128x256xf32>
    %34 = vector.extract_strided_slice %33 {offsets = [0, 0], sizes = [128, 128], strides = [1, 1]} : vector<128x256xf32> to vector<128x128xf32>
    %35 = arith.truncf %34 : vector<128x128xf32> to vector<128x128xbf16>
    %cst_16 = arith.constant dense<0.000000e+00> : vector<128x128xf32>
    %36 = tpu.matmul %0, %35, %cst_16 {dimension_numbers = #tpu.dot_dimension_numbers<[1], [0], [0], [1], [0, 0, 1, 1], [], []>} : vector<128x128xbf16>, vector<128x128xbf16>, vector<128x128xf32> -> vector<128x128xf32>
    %37 = vector.extract_strided_slice %33 {offsets = [0, 128], sizes = [128, 128], strides = [1, 1]} : vector<128x256xf32> to vector<128x128xf32>
    %38 = arith.addf %36, %37 : vector<128x128xf32>
    %39 = vector.extract_strided_slice %1 {offsets = [2, 0], sizes = [1, 128], strides = [1, 1]} : vector<8x128xf32> to vector<1x128xf32>
    %40 = vector.shape_cast %39 : vector<1x128xf32> to vector<128xf32>
    %41 = vector.shape_cast %40 : vector<128xf32> to vector<1x128xf32>
    %42 = vector.broadcast %41 : vector<1x128xf32> to vector<128x128xf32>
    %43 = arith.addf %38, %42 : vector<128x128xf32>
    %44 = arith.truncf %43 : vector<128x128xf32> to vector<128x128xbf16>
    %c3 = arith.constant 3 : index
    %c0_17 = arith.constant 0 : index
    %c0_18 = arith.constant 0 : index
    %45 = vector.load %arg3[%c3, %c0_17, %c0_18] : memref<4x128x256xbf16, #tpu.memory_space<vmem>>, vector<1x128x256xbf16>
    %46 = vector.shape_cast %45 : vector<1x128x256xbf16> to vector<128x256xbf16>
    %cst_19 = arith.constant dense<0.000000e+00> : vector<128x256xf32>
    %47 = tpu.matmul %44, %46, %cst_19 {dimension_numbers = #tpu.dot_dimension_numbers<[1], [0], [0], [1], [0, 0, 1, 1], [], []>} : vector<128x128xbf16>, vector<128x256xbf16>, vector<128x256xf32> -> vector<128x256xf32>
    %48 = vector.extract_strided_slice %47 {offsets = [0, 0], sizes = [128, 128], strides = [1, 1]} : vector<128x256xf32> to vector<128x128xf32>
    %49 = arith.truncf %48 : vector<128x128xf32> to vector<128x128xbf16>
    %cst_20 = arith.constant dense<0.000000e+00> : vector<128x128xf32>
    %50 = tpu.matmul %0, %49, %cst_20 {dimension_numbers = #tpu.dot_dimension_numbers<[1], [0], [0], [1], [0, 0, 1, 1], [], []>} : vector<128x128xbf16>, vector<128x128xbf16>, vector<128x128xf32> -> vector<128x128xf32>
    %51 = vector.extract_strided_slice %47 {offsets = [0, 128], sizes = [128, 128], strides = [1, 1]} : vector<128x256xf32> to vector<128x128xf32>
    %52 = arith.addf %50, %51 : vector<128x128xf32>
    %53 = vector.extract_strided_slice %1 {offsets = [3, 0], sizes = [1, 128], strides = [1, 1]} : vector<8x128xf32> to vector<1x128xf32>
    %54 = vector.shape_cast %53 : vector<1x128xf32> to vector<128xf32>
    %55 = vector.shape_cast %54 : vector<128xf32> to vector<1x128xf32>
    %56 = vector.broadcast %55 : vector<1x128xf32> to vector<128x128xf32>
    %57 = arith.addf %52, %56 : vector<128x128xf32>
    %c0_21 = arith.constant 0 : index
    %c0_22 = arith.constant 0 : index
    %58 = vector.load %arg5[%c0_21, %c0_22] : memref<128x128xf32, #tpu.memory_space<vmem>>, vector<128x128xf32>
    tpu.vector_store %arg5[%c0_21, %c0_22], %57 {strides = array<i32>} : memref<128x128xf32, #tpu.memory_space<vmem>>, vector<128x128xf32>,
    return
  }
  func.func @transform_0(%arg0: i32) -> (i32, i32) {
    %c0_i32 = arith.constant 0 : i32
    %c0_i32_0 = arith.constant 0 : i32
    %c0_i32_1 = arith.constant 0 : i32
    return %c0_i32, %c0_i32_0 : i32, i32
  }
  func.func @transform_1(%arg0: i32) -> (i32, i32) {
    %c0_i32 = arith.constant 0 : i32
    %c0_i32_0 = arith.constant 0 : i32
    %c0_i32_1 = arith.constant 0 : i32
    return %c0_i32, %c0_i32_0 : i32, i32
  }
  func.func @transform_2(%arg0: i32) -> (i32, i32, i32) {
    %c0_i32 = arith.constant 0 : i32
    %c0_i32_0 = arith.constant 0 : i32
    %c0_i32_1 = arith.constant 0 : i32
    %c0_i32_2 = arith.constant 0 : i32
    return %c0_i32, %c0_i32_0, %c0_i32_1 : i32, i32, i32
  }
  func.func @transform_3(%arg0: i32) -> (i32, i32) {
    %c0_i32 = arith.constant 0 : i32
    %c0_i32_0 = arith.constant 0 : i32
    %c0_i32_1 = arith.constant 0 : i32
    return %c0_i32, %c0_i32_0 : i32, i32
  }
  func.func @transform_4(%arg0: i32) -> (i32, i32) {
    %c0_i32 = arith.constant 0 : i32
    %c0_i32_0 = arith.constant 0 : i32
    %c0_i32_1 = arith.constant 0 : i32
    return %c0_i32, %c0_i32_0 : i32, i32
  }
}

</mosaic_0001>

<bundles_post_ra>
// kernel: sage_cox_forward.1
= control target key start
LH: loop header
LB: loop body
LE: loop exit
PB: predicated region body
PF: predicated region fallthrough
CT: control target
= control target key end

     0   :  { %v1965_v1 = vmov 0   ;;  %s2585_s2 = inlined_call_operand.vmem [shape: bf16[4,128,256], index: 2, kind: input, shape index: {}]   ;;  %s2586_s1 = inlined_call_operand.vmem [shape: bf16[128,128], index: 1, kind: input, shape index: {}]   ;;  %s2587_s0 = inlined_call_operand.vmem [shape: bf16[128,128], index: 0, kind: input, shape index: {}]   ;;  %s2588_s3 = inlined_call_operand.vmem [shape: f32[8,128], index: 3, kind: input, shape index: {}]   ;;  %s2589_s4 = inlined_call_operand.vmem [shape: f32[128,128], index: 4, kind: output, shape index: {}]  }
   0x1   :  { %v1851_v0 = vld [vmem:[%s2585_s2 + $0x4] ss:$8 sps:$4 sm:$0xff]   ;;  %227 = vmatprep.mubr.bf16.mxu0 %v1965_v1  ;;  %v1853_v2 = vld [vmem:[%s2585_s2] ss:$8 sps:$4 sm:$0xff]   ;;  %v1854_v3 = vld [vmem:[%s2585_s2 + $0x14] ss:$8 sps:$4 sm:$0xff]  }
   0x2   :  { %195 = vmatprep.subr.bf16.mxu0 %v1851_v0  ;;  %v1856_v4 = vld [vmem:[%s2585_s2 + $0x10] ss:$8 sps:$4 sm:$0xff]   ;;  %v1857_v5 = vld [vmem:[%s2585_s2 + $0x24] ss:$8 sps:$4 sm:$0xff]   ;;  %v1859_v6 = vld [vmem:[%s2585_s2 + $0x20] ss:$8 sps:$4 sm:$0xff]  }
   0x3   :  { %196 = vmatpush1.bf16.msra.mxu0 %v1853_v2  ;;  %v1860_v7 = vld [vmem:[%s2585_s2 + $0x34] ss:$8 sps:$4 sm:$0xff]   ;;  %v1862_v8 = vld [vmem:[%s2585_s2 + $0x30] ss:$8 sps:$4 sm:$0xff]   ;;  %v1863_v9 = vld [vmem:[%s2585_s2 + $0x44] ss:$8 sps:$4 sm:$0xff]  }
   0x4   :  { %197 = vmatprep.subr.bf16.mxu0 %v1854_v3  ;;  %v1865_v10 = vld [vmem:[%s2585_s2 + $0x40] ss:$8 sps:$4 sm:$0xff]   ;;  %v1866_v11 = vld [vmem:[%s2585_s2 + $0x54] ss:$8 sps:$4 sm:$0xff]   ;;  %v1868_v12 = vld [vmem:[%s2585_s2 + $0x50] ss:$8 sps:$4 sm:$0xff]  }
   0x5   :  { %v1869_v13 = vld [vmem:[%s2585_s2 + $0x64] ss:$8 sps:$4 sm:$0xff]   ;;  %v1871_v14 = vld [vmem:[%s2585_s2 + $0x60] ss:$8 sps:$4 sm:$0xff]   ;;  %v1872_v15 = vld [vmem:[%s2585_s2 + $0x74] ss:$8 sps:$4 sm:$0xff]  }
   0x6   :  { %v1874_v16 = vld [vmem:[%s2585_s2 + $0x70] ss:$8 sps:$4 sm:$0xff]   ;;  %v1875_v17 = vld [vmem:[%s2586_s1] sm:$0xff]   ;;  %v1876_v18 = vld [vmem:[%s2586_s1 + $0x8] sm:$0xff]  }
   0x7   :  { %198 = vmatpush1.bf16.msra.mxu0 %v1856_v4  ;;  %v1877_v19 = vld [vmem:[%s2586_s1 + $0x10] sm:$0xff]   ;;  %v1878_v20 = vld [vmem:[%s2586_s1 + $0x18] sm:$0xff]   ;;  %v1879_v21 = vld [vmem:[%s2586_s1 + $0x20] sm:$0xff]  }
   0x8   :  { %199 = vmatprep.subr.bf16.mxu0 %v1857_v5  ;;  %v1880_v22 = vld [vmem:[%s2586_s1 + $0x28] sm:$0xff]   ;;  %v1881_v23 = vld [vmem:[%s2586_s1 + $0x30] sm:$0xff]   ;;  %v1882_v24 = vld [vmem:[%s2586_s1 + $0x38] sm:$0xff]  }
   0x9   :  { %v2074_v25 = vld [vmem:[%s2587_s0] sm:$0xff]   ;;  %v2116_v4 = vld [vmem:[%s2587_s0 + $0x8] sm:$0xff]   ;;  %v2121_v5 = vld [vmem:[%s2587_s0 + $0x10] sm:$0xff]  }
   0xa   :  { %1738 = vmatprep.mubr.bf16.mxu1 %v2074_v25  ;;  %v1893_v3 = vld [vmem:[%s2585_s2 + $0x84] ss:$8 sps:$4 sm:$0xff]  }
   0xb   :  { %200 = vmatpush1.bf16.msra.mxu0 %v1859_v6  ;;  %v1891_v6 = vld [vmem:[%s2585_s2 + $0x80] ss:$8 sps:$4 sm:$0xff]  }
   0xc   :  { %201 = vmatprep.subr.bf16.mxu0 %v1860_v7  ;;  %v1896_v7 = vld [vmem:[%s2585_s2 + $0x94] ss:$8 sps:$4 sm:$0xff]  }
   0xf   :  { %202 = vmatpush1.bf16.msra.mxu0 %v1862_v8  ;;  %v1894_v8 = vld [vmem:[%s2585_s2 + $0x90] ss:$8 sps:$4 sm:$0xff]  }
  0x10   :  { %203 = vmatprep.subr.bf16.mxu0 %v1863_v9  ;;  %v1899_v9 = vld [vmem:[%s2585_s2 + $0xa4] ss:$8 sps:$4 sm:$0xff]  }
  0x13   :  { %204 = vmatpush1.bf16.msra.mxu0 %v1865_v10  ;;  %v2140_v10 = vld [vmem:[%s2587_s0 + $0x18] sm:$0xff]  }
  0x14   :  { %205 = vmatprep.subr.bf16.mxu0 %v1866_v11  ;;  %v2145_v11 = vld [vmem:[%s2587_s0 + $0x20] sm:$0xff]  }
  0x17   :  { %206 = vmatpush1.bf16.msra.mxu0 %v1868_v12  ;;  %v1897_v12 = vld [vmem:[%s2585_s2 + $0xa0] ss:$8 sps:$4 sm:$0xff]  }
  0x18   :  { %207 = vmatprep.subr.bf16.mxu0 %v1869_v13  ;;  %v1902_v13 = vld [vmem:[%s2585_s2 + $0xb4] ss:$8 sps:$4 sm:$0xff]  }
  0x1b   :  { %208 = vmatpush1.bf16.msra.mxu0 %v1871_v14  ;;  %v1900_v14 = vld [vmem:[%s2585_s2 + $0xb0] ss:$8 sps:$4 sm:$0xff]  }
  0x1c   :  { %209 = vmatprep.subr.bf16.mxu0 %v1872_v15  ;;  %v1905_v15 = vld [vmem:[%s2585_s2 + $0xc4] ss:$8 sps:$4 sm:$0xff]  }
  0x1f   :  { %210 = vmatpush1.bf16.msra.mxu0 %v1874_v16  ;;  %v2164_v16 = vld [vmem:[%s2587_s0 + $0x28] sm:$0xff]  }
  0x22   :  { %228 = vmatmul.mubr.bf16.vlgmr.msra.gmra.mrb[0].mxu0 %v1875_v17  ;;  %v2169_v17 = vld [vmem:[%s2587_s0 + $0x30] sm:$0xff]  }
  0x23   :  { %237 = vmatprep.mubr.bf16.mxu0 %v1965_v1 }
  0x2a   :  { %238 = vmatmul.mubr.bf16.gmra.mrb[4].mxu0 %v1876_v18  ;;  %v1903_v18 = vld [vmem:[%s2585_s2 + $0xc0] ss:$8 sps:$4 sm:$0xff]  }
  0x2b   :  { %247 = vmatprep.mubr.bf16.mxu0 %v1965_v1 }
  0x32   :  { %248 = vmatmul.mubr.bf16.gmra.mrb[8].mxu0 %v1877_v19  ;;  %v1908_v19 = vld [vmem:[%s2585_s2 + $0xd4] ss:$8 sps:$4 sm:$0xff]  }
  0x33   :  { %257 = vmatprep.mubr.bf16.mxu0 %v1965_v1 }
  0x3a   :  { %258 = vmatmul.mubr.bf16.gmra.mrb[12].mxu0 %v1878_v20  ;;  %v1906_v20 = vld [vmem:[%s2585_s2 + $0xd0] ss:$8 sps:$4 sm:$0xff]  }
  0x3b   :  { %267 = vmatprep.mubr.bf16.mxu0 %v1965_v1 }
  0x42   :  { %268 = vmatmul.mubr.bf16.gmra.mrb[16].mxu0 %v1879_v21  ;;  %v2185_v21 = vld [vmem:[%s2587_s0 + $0x38] sm:$0xff]  }
  0x43   :  { %277 = vmatprep.mubr.bf16.mxu0 %v1965_v1 }
  0x4a   :  { %278 = vmatmul.mubr.bf16.gmra.mrb[20].mxu0 %v1880_v22  ;;  %v1911_v22 = vld [vmem:[%s2585_s2 + $0xe4] ss:$8 sps:$4 sm:$0xff]  }
  0x4b   :  { %287 = vmatprep.mubr.bf16.mxu0 %v1965_v1 }
  0x52   :  { %288 = vmatmul.mubr.bf16.gmra.mrb[24].mxu0 %v1881_v23  ;;  %v1909_v23 = vld [vmem:[%s2585_s2 + $0xe0] ss:$8 sps:$4 sm:$0xff]  }
  0x53   :  { %297 = vmatprep.mubr.bf16.mxu0 %v1965_v1 }
  0x5a   :  { %298 = vmatmul.mubr.bf16.gmra.mrb[28].mxu0 %v1882_v24  ;;  %v1914_v24 = vld [vmem:[%s2585_s2 + $0xf4] ss:$8 sps:$4 sm:$0xff]  }
  0x5b   :  { %1770 = vmatprep.mubr.bf16.mxu0 %v2074_v25 }
  0xf5   :  { %v229_v26 = vpop.f32.mrb[0].mxu0 }
  0xf6   :  { %v2078_v27 = vpop.f32.mrb[1].mxu0 }
  0xf7   :  { %v233_v28 = vpop.f32.mrb[2].mxu0 }
  0xf8   :  { %v308_v29 = vpack.c.bf16 %v233_v28, %v229_v26  ;;  %v2080_v30 = vpop.f32.mrb[3].mxu0  ;;  %v1912_v26 = vld [vmem:[%s2585_s2 + $0xf0] ss:$8 sps:$4 sm:$0xff]   ;;  %v461_v28 = vlaneseq }
  0xfa   :  { %1722 = vmatprep.subr.bf16.mxu1 %v308_v29 }
  0xfb   :  { %1723 = vmatpush3.bf16.msra.mxu1 %v308_v29  ;;  %v2201_v29 = vshrl.u32 %v461_v28, 7 }
  0xfd   :  { %v239_v31 = vpop.f32.mrb[4].mxu0 }
  0xfe   :  { %v2082_v32 = vpop.f32.mrb[5].mxu0 }
  0xff   :  { %v243_v33 = vpop.f32.mrb[6].mxu0 }
 0x100   :  { %v309_v34 = vpack.c.bf16 %v243_v33, %v239_v31  ;;  %v2084_v35 = vpop.f32.mrb[7].mxu0  ;;  %v463_v31 = vsub.s32 0, %v2201_v29  ;;  %v2207_v33 = vld [vmem:[%s2588_s3] sm:$0xff] }
 0x102   :  { %1724 = vmatprep.subr.bf16.mxu1 %v309_v34 }
 0x103   :  { %1725 = vmatpush3.bf16.msra.mxu1 %v309_v34 }
 0x105   :  { %v249_v36 = vpop.f32.mrb[8].mxu0 }
 0x106   :  { %v2086_v37 = vpop.f32.mrb[9].mxu0 }
 0x107   :  { %v253_v38 = vpop.f32.mrb[10].mxu0 }
 0x108   :  { %v310_v39 = vpack.c.bf16 %v253_v38, %v249_v36  ;;  %v2088_v40 = vpop.f32.mrb[11].mxu0  ;;  %v464_v38 = vrot.slane %v2207_v33, %v463_v31 }
 0x10a   :  { %1726 = vmatprep.subr.bf16.mxu1 %v310_v39 }
 0x10b   :  { %1727 = vmatpush3.bf16.msra.mxu1 %v310_v39 }
 0x10d   :  { %v259_v41 = vpop.f32.mrb[12].mxu0 }
 0x10e   :  { %v2090_v42 = vpop.f32.mrb[13].mxu0 }
 0x10f   :  { %v263_v43 = vpop.f32.mrb[14].mxu0 }
 0x110   :  { %v311_v44 = vpack.c.bf16 %v263_v43, %v259_v41  ;;  %v2092_v45 = vpop.f32.mrb[15].mxu0 }
 0x112   :  { %1728 = vmatprep.subr.bf16.mxu1 %v311_v44 }
 0x113   :  { %1729 = vmatpush3.bf16.msra.mxu1 %v311_v44 }
 0x115   :  { %v269_v46 = vpop.f32.mrb[16].mxu0 }
 0x116   :  { %v2094_v47 = vpop.f32.mrb[17].mxu0 }
 0x117   :  { %v273_v48 = vpop.f32.mrb[18].mxu0 }
 0x118   :  { %v312_v49 = vpack.c.bf16 %v273_v48, %v269_v46  ;;  %v2096_v50 = vpop.f32.mrb[19].mxu0 }
 0x11a   :  { %1730 = vmatprep.subr.bf16.mxu1 %v312_v49 }
 0x11b   :  { %1731 = vmatpush3.bf16.msra.mxu1 %v312_v49 }
 0x11d   :  { %v279_v51 = vpop.f32.mrb[20].mxu0 }
 0x11e   :  { %v2098_v52 = vpop.f32.mrb[21].mxu0 }
 0x11f   :  { %v283_v53 = vpop.f32.mrb[22].mxu0 }
 0x120   :  { %v313_v54 = vpack.c.bf16 %v283_v53, %v279_v51  ;;  %v2100_v55 = vpop.f32.mrb[23].mxu0 }
 0x122   :  { %1732 = vmatprep.subr.bf16.mxu1 %v313_v54 }
 0x123   :  { %1733 = vmatpush3.bf16.msra.mxu1 %v313_v54 }
 0x125   :  { %v289_v56 = vpop.f32.mrb[24].mxu0 }
 0x126   :  { %v2102_v57 = vpop.f32.mrb[25].mxu0 }
 0x127   :  { %v293_v58 = vpop.f32.mrb[26].mxu0 }
 0x128   :  { %v314_v59 = vpack.c.bf16 %v293_v58, %v289_v56  ;;  %v2104_v60 = vpop.f32.mrb[27].mxu0 }
 0x12a   :  { %1734 = vmatprep.subr.bf16.mxu1 %v314_v59 }
 0x12b   :  { %1735 = vmatpush3.bf16.msra.mxu1 %v314_v59 }
 0x12d   :  { %v299_v61 = vpop.f32.mrb[28].mxu0 }
 0x12e   :  { %v2106_v62 = vpop.f32.mrb[29].mxu0 }
 0x12f   :  { %v303_v63 = vpop.f32.mrb[30].mxu0 }
 0x130   :  { %v315_v0 = vpack.c.bf16 %v303_v63, %v299_v61  ;;  %v2108_v2 = vpop.f32.mrb[31].mxu0 }
 0x132   :  { %1736 = vmatprep.subr.bf16.mxu1 %v315_v0 }
 0x133   :  { %1737 = vmatpush3.bf16.msra.mxu1 %v315_v0 }
 0x134   :  { %586 = vmatprep.subr.bf16.mxu1 %v1893_v3 }
 0x136   :  { %1739 = vmatmul.mubr.bf16.vlgmr.msra.gmra.mrb[0].mxu1 %v2116_v4 }
 0x137   :  { %1742 = vmatprep.mubr.bf16.mxu1 %v2121_v5  ;;  %587 = vmatpush1.bf16.msra.mxu1 %v1891_v6 }
 0x138   :  { %588 = vmatprep.subr.bf16.mxu1 %v1896_v7 }
 0x13b   :  { %589 = vmatpush1.bf16.msra.mxu1 %v1894_v8 }
 0x13c   :  { %590 = vmatprep.subr.bf16.mxu1 %v1899_v9 }
 0x13e   :  { %1743 = vmatmul.mubr.bf16.gmra.mrb[4].mxu1 %v2140_v10 }
 0x13f   :  { %1746 = vmatprep.mubr.bf16.mxu1 %v2145_v11  ;;  %591 = vmatpush1.bf16.msra.mxu1 %v1897_v12 }
 0x140   :  { %592 = vmatprep.subr.bf16.mxu1 %v1902_v13 }
 0x143   :  { %593 = vmatpush1.bf16.msra.mxu1 %v1900_v14 }
 0x144   :  { %594 = vmatprep.subr.bf16.mxu1 %v1905_v15 }
 0x146   :  { %1747 = vmatmul.mubr.bf16.gmra.mrb[8].mxu1 %v2164_v16 }
 0x147   :  { %1750 = vmatprep.mubr.bf16.mxu1 %v2169_v17  ;;  %595 = vmatpush1.bf16.msra.mxu1 %v1903_v18 }
 0x148   :  { %596 = vmatprep.subr.bf16.mxu1 %v1908_v19 }
 0x14b   :  { %597 = vmatpush1.bf16.msra.mxu1 %v1906_v20 }
 0x14c   :  { %598 = vmatprep.subr.bf16.mxu1 %v1911_v22 }
 0x14e   :  { %1751 = vmatmul.mubr.bf16.gmra.mrb[12].mxu1 %v2185_v21 }
 0x14f   :  { %618 = vmatprep.mubr.bf16.mxu1 %v1965_v1  ;;  %599 = vmatpush1.bf16.msra.mxu1 %v1909_v23 }
 0x150   :  { %600 = vmatprep.subr.bf16.mxu1 %v1914_v24 }
 0x153   :  { %601 = vmatpush1.bf16.msra.mxu1 %v1912_v26 }
 0x209   :  { %v1740_v34 = vpop.f32.mrb[0].mxu1 }
 0x20a   :  { %v407_v36 = vadd.f32 %v1740_v34, %v2082_v32  ;;  %v398_v39 = vpop.f32.mrb[1].mxu1 }
 0x20b   :  { %v399_v41 = vadd.f32 %v398_v39, %v2078_v27  ;;  %v1741_v43 = vpop.f32.mrb[2].mxu1 }
 0x20c   :  { %v410_v44 = vadd.f32 %v1741_v43, %v2084_v35  ;;  %v401_v46 = vpop.f32.mrb[3].mxu1  ;;  %v467_v49 = vadd.f32 %v464_v38, %v407_v36 }
 0x20d   :  { %v402_v48 = vadd.f32 %v401_v46, %v2080_v30  ;;  %v465_v53 = vadd.f32 %v464_v38, %v399_v41 }
 0x20e   :  { %v468_v51 = vadd.f32 %v464_v38, %v410_v44 }
 0x20f   :  { %v466_v54 = vadd.f32 %v464_v38, %v402_v48 }
 0x210   :  { %v482_v56 = vpack.c.bf16 %v468_v51, %v467_v49 }
 0x211   :  { %v481_v58 = vpack.c.bf16 %v466_v54, %v465_v53  ;;  %v1744_v59 = vpop.f32.mrb[4].mxu1 }
 0x212   :  { %v423_v32 = vadd.f32 %v1744_v59, %v2090_v42  ;;  %v414_v61 = vpop.f32.mrb[5].mxu1 }
 0x213   :  { %v415_v63 = vadd.f32 %v414_v61, %v2086_v37  ;;  %v1745_v0 = vpop.f32.mrb[6].mxu1  ;;  %619 = vmatmul.mubr.bf16.vlgmr.msra.gmra.mrb[16].mxu1 %v481_v58 }
 0x214   :  { %v426_v27 = vadd.f32 %v1745_v0, %v2092_v45  ;;  %v417_v35 = vpop.f32.mrb[7].mxu1  ;;  %628 = vmatprep.mubr.bf16.mxu1 %v1965_v1  ;;  %v471_v3 = vadd.f32 %v464_v38, %v423_v32 }
 0x215   :  { %v418_v30 = vadd.f32 %v417_v35, %v2088_v40  ;;  %v469_v7 = vadd.f32 %v464_v38, %v415_v63 }
 0x216   :  { %v472_v6 = vadd.f32 %v464_v38, %v426_v27 }
 0x217   :  { %v470_v8 = vadd.f32 %v464_v38, %v418_v30 }
 0x218   :  { %v484_v9 = vpack.c.bf16 %v472_v6, %v471_v3 }
 0x219   :  { %v1748_v12 = vpop.f32.mrb[8].mxu1  ;;  %v483_v13 = vpack.c.bf16 %v470_v8, %v469_v7 }
 0x21a   :  { %v439_v42 = vadd.f32 %v1748_v12, %v2098_v52  ;;  %v430_v14 = vpop.f32.mrb[9].mxu1 }
 0x21b   :  { %v431_v37 = vadd.f32 %v430_v14, %v2094_v47  ;;  %v1749_v15 = vpop.f32.mrb[10].mxu1  ;;  %629 = vmatmul.mubr.bf16.gmra.mrb[20].mxu1 %v482_v56 }
 0x21c   :  { %v442_v45 = vadd.f32 %v1749_v15, %v2100_v55  ;;  %v433_v18 = vpop.f32.mrb[11].mxu1  ;;  %638 = vmatprep.mubr.bf16.mxu1 %v1965_v1  ;;  %v475_v19 = vadd.f32 %v464_v38, %v439_v42 }
 0x21d   :  { %v434_v40 = vadd.f32 %v433_v18, %v2096_v50  ;;  %v473_v22 = vadd.f32 %v464_v38, %v431_v37 }
 0x21e   :  { %v476_v20 = vadd.f32 %v464_v38, %v442_v45 }
 0x21f   :  { %v474_v23 = vadd.f32 %v464_v38, %v434_v40 }
 0x220   :  { %v486_v24 = vpack.c.bf16 %v476_v20, %v475_v19 }
 0x221   :  { %v1752_v26 = vpop.f32.mrb[12].mxu1  ;;  %v485_v28 = vpack.c.bf16 %v474_v23, %v473_v22 }
 0x222   :  { %v455_v52 = vadd.f32 %v1752_v26, %v2106_v62  ;;  %v446_v31 = vpop.f32.mrb[13].mxu1 }
 0x223   :  { %v447_v47 = vadd.f32 %v446_v31, %v2102_v57  ;;  %v1753_v34 = vpop.f32.mrb[14].mxu1  ;;  %639 = vmatmul.mubr.bf16.gmra.mrb[24].mxu1 %v483_v13  ;;  %v1915_v31 = vld [vmem:[%s2585_s2 + $0x100] ss:$8 sps:$4 sm:$0xff]  }
 0x224   :  { %v458_v55 = vadd.f32 %v1753_v34, %v2108_v2  ;;  %v449_v36 = vpop.f32.mrb[15].mxu1  ;;  %648 = vmatprep.mubr.bf16.mxu1 %v1965_v1  ;;  %v479_v39 = vadd.f32 %v464_v38, %v455_v52  ;;  %v1917_v52 = vld [vmem:[%s2585_s2 + $0x104] ss:$8 sps:$4 sm:$0xff]   ;;  %v1918_v34 = vld [vmem:[%s2585_s2 + $0x110] ss:$8 sps:$4 sm:$0xff]  }
 0x225   :  { %v450_v50 = vadd.f32 %v449_v36, %v2104_v60  ;;  %v477_v43 = vadd.f32 %v464_v38, %v447_v47  ;;  %v1920_v47 = vld [vmem:[%s2585_s2 + $0x114] ss:$8 sps:$4 sm:$0xff]   ;;  %v1921_v36 = vld [vmem:[%s2585_s2 + $0x120] ss:$8 sps:$4 sm:$0xff]  }
 0x226   :  { %v480_v41 = vadd.f32 %v464_v38, %v458_v55  ;;  %v1923_v55 = vld [vmem:[%s2585_s2 + $0x124] ss:$8 sps:$4 sm:$0xff]  }
 0x227   :  { %v478_v44 = vadd.f32 %v464_v38, %v450_v50  ;;  %v1926_v50 = vld [vmem:[%s2585_s2 + $0x134] ss:$8 sps:$4 sm:$0xff]  }
 0x228   :  { %v488_v46 = vpack.c.bf16 %v480_v41, %v479_v39  ;;  %v1924_v39 = vld [vmem:[%s2585_s2 + $0x130] ss:$8 sps:$4 sm:$0xff]   ;;  %v1929_v41 = vld [vmem:[%s2585_s2 + $0x144] ss:$8 sps:$4 sm:$0xff]  }
 0x229   :  { %v487_v48 = vpack.c.bf16 %v478_v44, %v477_v43  ;;  %v1927_v43 = vld [vmem:[%s2585_s2 + $0x140] ss:$8 sps:$4 sm:$0xff]   ;;  %v1932_v44 = vld [vmem:[%s2585_s2 + $0x154] ss:$8 sps:$4 sm:$0xff]  }
 0x22b   :  { %649 = vmatmul.mubr.bf16.gmra.mrb[28].mxu1 %v484_v9 }
 0x22c   :  { %658 = vmatprep.mubr.bf16.mxu1 %v1965_v1 }
 0x233   :  { %659 = vmatmul.mubr.bf16.gmra.mrb[32].mxu1 %v485_v28 }
 0x234   :  { %668 = vmatprep.mubr.bf16.mxu1 %v1965_v1 }
 0x23b   :  { %669 = vmatmul.mubr.bf16.gmra.mrb[36].mxu1 %v486_v24 }
 0x23c   :  { %678 = vmatprep.mubr.bf16.mxu1 %v1965_v1 }
 0x243   :  { %679 = vmatmul.mubr.bf16.gmra.mrb[40].mxu1 %v487_v48  ;;  %v1935_v48 = vld [vmem:[%s2585_s2 + $0x164] ss:$8 sps:$4 sm:$0xff]  }
 0x244   :  { %688 = vmatprep.mubr.bf16.mxu1 %v1965_v1 }
 0x24b   :  { %689 = vmatmul.mubr.bf16.gmra.mrb[44].mxu1 %v488_v46  ;;  %v1930_v46 = vld [vmem:[%s2585_s2 + $0x150] ss:$8 sps:$4 sm:$0xff]  }
 0x24c   :  { %1802 = vmatprep.mubr.bf16.mxu1 %v2074_v25 }
 0x2e6   :  { %v620_v57 = vpop.f32.mrb[16].mxu1 }
 0x2e7   :  { %v2234_v60 = vpop.f32.mrb[17].mxu1 }
 0x2e8   :  { %v624_v62 = vpop.f32.mrb[18].mxu1 }
 0x2e9   :  { %v699_v2 = vpack.c.bf16 %v624_v62, %v620_v57  ;;  %v2236_v38 = vpop.f32.mrb[19].mxu1  ;;  %v1933_v57 = vld [vmem:[%s2585_s2 + $0x160] ss:$8 sps:$4 sm:$0xff]   ;;  %v1938_v62 = vld [vmem:[%s2585_s2 + $0x174] ss:$8 sps:$4 sm:$0xff]  }
 0x2eb   :  { %1754 = vmatprep.subr.bf16.mxu0 %v699_v2 }
 0x2ec   :  { %1755 = vmatpush3.bf16.msra.mxu0 %v699_v2  ;;  %v1936_v2 = vld [vmem:[%s2585_s2 + $0x170] ss:$8 sps:$4 sm:$0xff]  }
 0x2ee   :  { %v630_v49 = vpop.f32.mrb[20].mxu1 }
 0x2ef   :  { %v2238_v51 = vpop.f32.mrb[21].mxu1 }
 0x2f0   :  { %v634_v53 = vpop.f32.mrb[22].mxu1 }
 0x2f1   :  { %v700_v54 = vpack.c.bf16 %v634_v53, %v630_v49  ;;  %v2240_v56 = vpop.f32.mrb[23].mxu1  ;;  %v806_v49 = vsub.s32 1, %v2201_v29 }
 0x2f3   :  { %1756 = vmatprep.subr.bf16.mxu0 %v700_v54 }
 0x2f4   :  { %1757 = vmatpush3.bf16.msra.mxu0 %v700_v54 }
 0x2f6   :  { %v640_v58 = vpop.f32.mrb[24].mxu1 }
 0x2f7   :  { %v2242_v59 = vpop.f32.mrb[25].mxu1 }
 0x2f8   :  { %v644_v32 = vpop.f32.mrb[26].mxu1 }
 0x2f9   :  { %v701_v61 = vpack.c.bf16 %v644_v32, %v640_v58  ;;  %v2244_v63 = vpop.f32.mrb[27].mxu1  ;;  %v807_v58 = vrot.slane %v2207_v33, %v806_v49 }
 0x2fb   :  { %1758 = vmatprep.subr.bf16.mxu0 %v701_v61 }
 0x2fc   :  { %1759 = vmatpush3.bf16.msra.mxu0 %v701_v61 }
 0x2fe   :  { %v650_v0 = vpop.f32.mrb[28].mxu1 }
 0x2ff   :  { %v2246_v27 = vpop.f32.mrb[29].mxu1 }
 0x300   :  { %v654_v35 = vpop.f32.mrb[30].mxu1 }
 0x301   :  { %v702_v30 = vpack.c.bf16 %v654_v35, %v650_v0  ;;  %v2248_v3 = vpop.f32.mrb[31].mxu1 }
 0x303   :  { %1760 = vmatprep.subr.bf16.mxu0 %v702_v30 }
 0x304   :  { %1761 = vmatpush3.bf16.msra.mxu0 %v702_v30 }
 0x306   :  { %v660_v6 = vpop.f32.mrb[32].mxu1 }
 0x307   :  { %v2250_v7 = vpop.f32.mrb[33].mxu1 }
 0x308   :  { %v664_v8 = vpop.f32.mrb[34].mxu1 }
 0x309   :  { %v703_v9 = vpack.c.bf16 %v664_v8, %v660_v6  ;;  %v2252_v12 = vpop.f32.mrb[35].mxu1 }
 0x30b   :  { %1762 = vmatprep.subr.bf16.mxu0 %v703_v9 }
 0x30c   :  { %1763 = vmatpush3.bf16.msra.mxu0 %v703_v9 }
 0x30e   :  { %v670_v13 = vpop.f32.mrb[36].mxu1 }
 0x30f   :  { %v2254_v42 = vpop.f32.mrb[37].mxu1 }
 0x310   :  { %v674_v14 = vpop.f32.mrb[38].mxu1 }
 0x311   :  { %v704_v37 = vpack.c.bf16 %v674_v14, %v670_v13  ;;  %v2256_v15 = vpop.f32.mrb[39].mxu1 }
 0x313   :  { %1764 = vmatprep.subr.bf16.mxu0 %v704_v37 }
 0x314   :  { %1765 = vmatpush3.bf16.msra.mxu0 %v704_v37 }
 0x316   :  { %v680_v45 = vpop.f32.mrb[40].mxu1 }
 0x317   :  { %v2258_v18 = vpop.f32.mrb[41].mxu1 }
 0x318   :  { %v684_v40 = vpop.f32.mrb[42].mxu1 }
 0x319   :  { %v705_v19 = vpack.c.bf16 %v684_v40, %v680_v45  ;;  %v2260_v20 = vpop.f32.mrb[43].mxu1 }
 0x31b   :  { %1766 = vmatprep.subr.bf16.mxu0 %v705_v19 }
 0x31c   :  { %1767 = vmatpush3.bf16.msra.mxu0 %v705_v19 }
 0x31e   :  { %v690_v22 = vpop.f32.mrb[44].mxu1 }
 0x31f   :  { %v2262_v23 = vpop.f32.mrb[45].mxu1 }
 0x320   :  { %v694_v24 = vpop.f32.mrb[46].mxu1 }
 0x321   :  { %v706_v26 = vpack.c.bf16 %v694_v24, %v690_v22  ;;  %v2264_v28 = vpop.f32.mrb[47].mxu1 }
 0x323   :  { %1768 = vmatprep.subr.bf16.mxu0 %v706_v26 }
 0x324   :  { %1769 = vmatpush3.bf16.msra.mxu0 %v706_v26 }
 0x325   :  { %929 = vmatprep.subr.bf16.mxu0 %v1917_v52 }
 0x327   :  { %1771 = vmatmul.mubr.bf16.vlgmr.msra.gmra.mrb[32].mxu0 %v2116_v4 }
 0x328   :  { %1774 = vmatprep.mubr.bf16.mxu0 %v2121_v5  ;;  %930 = vmatpush1.bf16.msra.mxu0 %v1915_v31 }
 0x329   :  { %931 = vmatprep.subr.bf16.mxu0 %v1920_v47 }
 0x32c   :  { %932 = vmatpush1.bf16.msra.mxu0 %v1918_v34 }
 0x32d   :  { %933 = vmatprep.subr.bf16.mxu0 %v1923_v55 }
 0x32f   :  { %1775 = vmatmul.mubr.bf16.gmra.mrb[36].mxu0 %v2140_v10 }
 0x330   :  { %1778 = vmatprep.mubr.bf16.mxu0 %v2145_v11  ;;  %934 = vmatpush1.bf16.msra.mxu0 %v1921_v36 }
 0x331   :  { %935 = vmatprep.subr.bf16.mxu0 %v1926_v50 }
 0x334   :  { %936 = vmatpush1.bf16.msra.mxu0 %v1924_v39 }
 0x335   :  { %937 = vmatprep.subr.bf16.mxu0 %v1929_v41 }
 0x337   :  { %1779 = vmatmul.mubr.bf16.gmra.mrb[40].mxu0 %v2164_v16 }
 0x338   :  { %1782 = vmatprep.mubr.bf16.mxu0 %v2169_v17  ;;  %938 = vmatpush1.bf16.msra.mxu0 %v1927_v43 }
 0x339   :  { %939 = vmatprep.subr.bf16.mxu0 %v1932_v44 }
 0x33c   :  { %940 = vmatpush1.bf16.msra.mxu0 %v1930_v46 }
 0x33d   :  { %941 = vmatprep.subr.bf16.mxu0 %v1935_v48 }
 0x33f   :  { %1783 = vmatmul.mubr.bf16.gmra.mrb[44].mxu0 %v2185_v21 }
 0x340   :  { %961 = vmatprep.mubr.bf16.mxu0 %v1965_v1  ;;  %942 = vmatpush1.bf16.msra.mxu0 %v1933_v57 }
 0x341   :  { %943 = vmatprep.subr.bf16.mxu0 %v1938_v62 }
 0x344   :  { %944 = vmatpush1.bf16.msra.mxu0 %v1936_v2 }
 0x3fa   :  { %v1772_v53 = vpop.f32.mrb[32].mxu0 }
 0x3fb   :  { %v750_v54 = vadd.f32 %v1772_v53, %v2238_v51  ;;  %v741_v32 = vpop.f32.mrb[33].mxu0 }
 0x3fc   :  { %v742_v61 = vadd.f32 %v741_v32, %v2234_v60  ;;  %v1773_v0 = vpop.f32.mrb[34].mxu0 }
 0x3fd   :  { %v753_v35 = vadd.f32 %v1773_v0, %v2240_v56  ;;  %v744_v30 = vpop.f32.mrb[35].mxu0  ;;  %v810_v8 = vadd.f32 %v807_v58, %v750_v54 }
 0x3fe   :  { %v745_v6 = vadd.f32 %v744_v30, %v2236_v38  ;;  %v808_v13 = vadd.f32 %v807_v58, %v742_v61 }
 0x3ff   :  { %v811_v9 = vadd.f32 %v807_v58, %v753_v35 }
 0x400   :  { %v809_v14 = vadd.f32 %v807_v58, %v745_v6 }
 0x401   :  { %v825_v37 = vpack.c.bf16 %v811_v9, %v810_v8 }
 0x402   :  { %v824_v45 = vpack.c.bf16 %v809_v14, %v808_v13  ;;  %v1776_v40 = vpop.f32.mrb[36].mxu0 }
 0x403   :  { %v766_v51 = vadd.f32 %v1776_v40, %v2246_v27  ;;  %v757_v19 = vpop.f32.mrb[37].mxu0 }
 0x404   :  { %v758_v22 = vadd.f32 %v757_v19, %v2242_v59  ;;  %v1777_v24 = vpop.f32.mrb[38].mxu0  ;;  %962 = vmatmul.mubr.bf16.vlgmr.msra.gmra.mrb[48].mxu0 %v824_v45 }
 0x405   :  { %v769_v60 = vadd.f32 %v1777_v24, %v2248_v3  ;;  %v760_v56 = vpop.f32.mrb[39].mxu0  ;;  %971 = vmatprep.mubr.bf16.mxu0 %v1965_v1  ;;  %v814_v26 = vadd.f32 %v807_v58, %v766_v51 }
 0x406   :  { %v761_v38 = vadd.f32 %v760_v56, %v2244_v63  ;;  %v812_v31 = vadd.f32 %v807_v58, %v758_v22 }
 0x407   :  { %v815_v52 = vadd.f32 %v807_v58, %v769_v60 }
 0x408   :  { %v813_v47 = vadd.f32 %v807_v58, %v761_v38 }
 0x409   :  { %v827_v34 = vpack.c.bf16 %v815_v52, %v814_v26 }
 0x40a   :  { %v1780_v55 = vpop.f32.mrb[40].mxu0  ;;  %v826_v36 = vpack.c.bf16 %v813_v47, %v812_v31 }
 0x40b   :  { %v782_v27 = vadd.f32 %v1780_v55, %v2254_v42  ;;  %v773_v50 = vpop.f32.mrb[41].mxu0 }
 0x40c   :  { %v774_v59 = vadd.f32 %v773_v50, %v2250_v7  ;;  %v1781_v39 = vpop.f32.mrb[42].mxu0  ;;  %972 = vmatmul.mubr.bf16.gmra.mrb[52].mxu0 %v825_v37 }
 0x40d   :  { %v785_v3 = vadd.f32 %v1781_v39, %v2256_v15  ;;  %v776_v41 = vpop.f32.mrb[43].mxu0  ;;  %981 = vmatprep.mubr.bf16.mxu0 %v1965_v1  ;;  %v818_v43 = vadd.f32 %v807_v58, %v782_v27 }
 0x40e   :  { %v777_v63 = vadd.f32 %v776_v41, %v2252_v12  ;;  %v816_v46 = vadd.f32 %v807_v58, %v774_v59 }
 0x40f   :  { %v819_v44 = vadd.f32 %v807_v58, %v785_v3 }
 0x410   :  { %v817_v48 = vadd.f32 %v807_v58, %v777_v63 }
 0x411   :  { %v829_v57 = vpack.c.bf16 %v819_v44, %v818_v43 }
 0x412   :  { %v1784_v62 = vpop.f32.mrb[44].mxu0  ;;  %v828_v2 = vpack.c.bf16 %v817_v48, %v816_v46 }
 0x413   :  { %v798_v42 = vadd.f32 %v1784_v62, %v2262_v23  ;;  %v789_v49 = vpop.f32.mrb[45].mxu0 }
 0x414   :  { %v790_v7 = vadd.f32 %v789_v49, %v2258_v18  ;;  %v1785_v53 = vpop.f32.mrb[46].mxu0  ;;  %982 = vmatmul.mubr.bf16.gmra.mrb[56].mxu0 %v826_v36  ;;  %v1944_v49 = vld [vmem:[%s2585_s2 + $0x194] ss:$8 sps:$4 sm:$0xff]  }
 0x415   :  { %v801_v15 = vadd.f32 %v1785_v53, %v2264_v28  ;;  %v792_v54 = vpop.f32.mrb[47].mxu0  ;;  %991 = vmatprep.mubr.bf16.mxu0 %v1965_v1  ;;  %v822_v32 = vadd.f32 %v807_v58, %v798_v42  ;;  %v1939_v42 = vld [vmem:[%s2585_s2 + $0x180] ss:$8 sps:$4 sm:$0xff]   ;;  %v1947_v53 = vld [vmem:[%s2585_s2 + $0x1a4] ss:$8 sps:$4 sm:$0xff]  }
 0x416   :  { %v793_v12 = vadd.f32 %v792_v54, %v2260_v20  ;;  %v820_v0 = vadd.f32 %v807_v58, %v790_v7  ;;  %v1942_v7 = vld [vmem:[%s2585_s2 + $0x190] ss:$8 sps:$4 sm:$0xff]   ;;  %v1953_v54 = vld [vmem:[%s2585_s2 + $0x1c4] ss:$8 sps:$4 sm:$0xff]  }
 0x417   :  { %v823_v61 = vadd.f32 %v807_v58, %v801_v15  ;;  %v1945_v15 = vld [vmem:[%s2585_s2 + $0x1a0] ss:$8 sps:$4 sm:$0xff]  }
 0x418   :  { %v821_v35 = vadd.f32 %v807_v58, %v793_v12  ;;  %v1951_v12 = vld [vmem:[%s2585_s2 + $0x1c0] ss:$8 sps:$4 sm:$0xff]  }
 0x419   :  { %v831_v30 = vpack.c.bf16 %v823_v61, %v822_v32  ;;  %v1956_v32 = vld [vmem:[%s2585_s2 + $0x1d4] ss:$8 sps:$4 sm:$0xff]   ;;  %v1954_v61 = vld [vmem:[%s2585_s2 + $0x1d0] ss:$8 sps:$4 sm:$0xff]  }
 0x41a   :  { %v830_v6 = vpack.c.bf16 %v821_v35, %v820_v0  ;;  %v1959_v0 = vld [vmem:[%s2585_s2 + $0x1e4] ss:$8 sps:$4 sm:$0xff]   ;;  %v1957_v35 = vld [vmem:[%s2585_s2 + $0x1e0] ss:$8 sps:$4 sm:$0xff]  }
 0x41c   :  { %992 = vmatmul.mubr.bf16.gmra.mrb[60].mxu0 %v827_v34 }
 0x41d   :  { %1001 = vmatprep.mubr.bf16.mxu0 %v1965_v1 }
 0x424   :  { %1002 = vmatmul.mubr.bf16.gmra.mrb[64].mxu0 %v828_v2  ;;  %v1941_v2 = vld [vmem:[%s2585_s2 + $0x184] ss:$8 sps:$4 sm:$0xff]  }
 0x425   :  { %1011 = vmatprep.mubr.bf16.mxu0 %v1965_v1 }
 0x42c   :  { %1012 = vmatmul.mubr.bf16.gmra.mrb[68].mxu0 %v829_v57 }
 0x42d   :  { %1021 = vmatprep.mubr.bf16.mxu0 %v1965_v1 }
 0x434   :  { %1022 = vmatmul.mubr.bf16.gmra.mrb[72].mxu0 %v830_v6  ;;  %v1960_v6 = vld [vmem:[%s2585_s2 + $0x1f0] ss:$8 sps:$4 sm:$0xff]  }
 0x435   :  { %1031 = vmatprep.mubr.bf16.mxu0 %v1965_v1 }
 0x43c   :  { %1032 = vmatmul.mubr.bf16.gmra.mrb[76].mxu0 %v831_v30  ;;  %v1962_v30 = vld [vmem:[%s2585_s2 + $0x1f4] ss:$8 sps:$4 sm:$0xff]  }
 0x43d   :  { %1834 = vmatprep.mubr.bf16.mxu0 %v2074_v25 }
 0x4d7   :  { %v963_v18 = vpop.f32.mrb[48].mxu0 }
 0x4d8   :  { %v2348_v20 = vpop.f32.mrb[49].mxu0 }
 0x4d9   :  { %v967_v23 = vpop.f32.mrb[50].mxu0 }
 0x4da   :  { %v1042_v28 = vpack.c.bf16 %v967_v23, %v963_v18  ;;  %v2350_v58 = vpop.f32.mrb[51].mxu0  ;;  %v1149_v18 = vsub.s32 2, %v2201_v29 }
 0x4dc   :  { %1786 = vmatprep.subr.bf16.mxu1 %v1042_v28 }
 0x4dd   :  { %1787 = vmatpush3.bf16.msra.mxu1 %v1042_v28 }
 0x4df   :  { %v973_v8 = vpop.f32.mrb[52].mxu0 }
 0x4e0   :  { %v2352_v9 = vpop.f32.mrb[53].mxu0 }
 0x4e1   :  { %v977_v13 = vpop.f32.mrb[54].mxu0 }
 0x4e2   :  { %v1043_v14 = vpack.c.bf16 %v977_v13, %v973_v8  ;;  %v2354_v37 = vpop.f32.mrb[55].mxu0  ;;  %v1150_v8 = vrot.slane %v2207_v33, %v1149_v18 }
 0x4e4   :  { %1788 = vmatprep.subr.bf16.mxu1 %v1043_v14 }
 0x4e5   :  { %1789 = vmatpush3.bf16.msra.mxu1 %v1043_v14 }
 0x4e7   :  { %v983_v45 = vpop.f32.mrb[56].mxu0 }
 0x4e8   :  { %v2356_v25 = vpop.f32.mrb[57].mxu0 }
 0x4e9   :  { %v987_v40 = vpop.f32.mrb[58].mxu0 }
 0x4ea   :  { %v1044_v51 = vpack.c.bf16 %v987_v40, %v983_v45  ;;  %v2358_v19 = vpop.f32.mrb[59].mxu0 }
 0x4ec   :  { %1790 = vmatprep.subr.bf16.mxu1 %v1044_v51 }
 0x4ed   :  { %1791 = vmatpush3.bf16.msra.mxu1 %v1044_v51 }
 0x4ef   :  { %v993_v22 = vpop.f32.mrb[60].mxu0 }
 0x4f0   :  { %v2360_v24 = vpop.f32.mrb[61].mxu0 }
 0x4f1   :  { %v997_v60 = vpop.f32.mrb[62].mxu0 }
 0x4f2   :  { %v1045_v56 = vpack.c.bf16 %v997_v60, %v993_v22  ;;  %v2362_v38 = vpop.f32.mrb[63].mxu0 }
 0x4f4   :  { %1792 = vmatprep.subr.bf16.mxu1 %v1045_v56 }
 0x4f5   :  { %1793 = vmatpush3.bf16.msra.mxu1 %v1045_v56 }
 0x4f7   :  { %v1003_v26 = vpop.f32.mrb[64].mxu0 }
 0x4f8   :  { %v2364_v52 = vpop.f32.mrb[65].mxu0 }
 0x4f9   :  { %v1007_v31 = vpop.f32.mrb[66].mxu0 }
 0x4fa   :  { %v1046_v47 = vpack.c.bf16 %v1007_v31, %v1003_v26  ;;  %v2366_v34 = vpop.f32.mrb[67].mxu0 }
 0x4fc   :  { %1794 = vmatprep.subr.bf16.mxu1 %v1046_v47 }
 0x4fd   :  { %1795 = vmatpush3.bf16.msra.mxu1 %v1046_v47 }
 0x4ff   :  { %v1013_v55 = vpop.f32.mrb[68].mxu0 }
 0x500   :  { %v2368_v36 = vpop.f32.mrb[69].mxu0 }
 0x501   :  { %v1017_v27 = vpop.f32.mrb[70].mxu0 }
 0x502   :  { %v1047_v50 = vpack.c.bf16 %v1017_v27, %v1013_v55  ;;  %v2370_v59 = vpop.f32.mrb[71].mxu0 }
 0x504   :  { %1796 = vmatprep.subr.bf16.mxu1 %v1047_v50 }
 0x505   :  { %1797 = vmatpush3.bf16.msra.mxu1 %v1047_v50 }
 0x507   :  { %v1023_v39 = vpop.f32.mrb[72].mxu0 }
 0x508   :  { %v2372_v3 = vpop.f32.mrb[73].mxu0 }
 0x509   :  { %v1027_v41 = vpop.f32.mrb[74].mxu0 }
 0x50a   :  { %v1048_v63 = vpack.c.bf16 %v1027_v41, %v1023_v39  ;;  %v2374_v43 = vpop.f32.mrb[75].mxu0 }
 0x50c   :  { %1798 = vmatprep.subr.bf16.mxu1 %v1048_v63 }
 0x50d   :  { %1799 = vmatpush3.bf16.msra.mxu1 %v1048_v63 }
 0x50f   :  { %v1033_v44 = vpop.f32.mrb[76].mxu0 }
 0x510   :  { %v2376_v46 = vpop.f32.mrb[77].mxu0 }
 0x511   :  { %v1037_v48 = vpop.f32.mrb[78].mxu0 }
 0x512   :  { %v1049_v57 = vpack.c.bf16 %v1037_v48, %v1033_v44  ;;  %v2378_v62 = vpop.f32.mrb[79].mxu0 }
 0x514   :  { %1800 = vmatprep.subr.bf16.mxu1 %v1049_v57 }
 0x515   :  { %1801 = vmatpush3.bf16.msra.mxu1 %v1049_v57 }
 0x516   :  { %1272 = vmatprep.subr.bf16.mxu1 %v1941_v2 }
 0x518   :  { %1803 = vmatmul.mubr.bf16.vlgmr.msra.gmra.mrb[48].mxu1 %v2116_v4  ;;  %v1950_v4 = vld [vmem:[%s2585_s2 + $0x1b4] ss:$8 sps:$4 sm:$0xff]  }
 0x519   :  { %1806 = vmatprep.mubr.bf16.mxu1 %v2121_v5  ;;  %1273 = vmatpush1.bf16.msra.mxu1 %v1939_v42  ;;  %v1948_v5 = vld [vmem:[%s2585_s2 + $0x1b0] ss:$8 sps:$4 sm:$0xff]  }
 0x51a   :  { %1274 = vmatprep.subr.bf16.mxu1 %v1944_v49 }
 0x51d   :  { %1275 = vmatpush1.bf16.msra.mxu1 %v1942_v7 }
 0x51e   :  { %1276 = vmatprep.subr.bf16.mxu1 %v1947_v53 }
 0x520   :  { %1807 = vmatmul.mubr.bf16.gmra.mrb[52].mxu1 %v2140_v10 }
 0x521   :  { %1810 = vmatprep.mubr.bf16.mxu1 %v2145_v11  ;;  %1277 = vmatpush1.bf16.msra.mxu1 %v1945_v15 }
 0x522   :  { %1278 = vmatprep.subr.bf16.mxu1 %v1950_v4 }
 0x525   :  { %1279 = vmatpush1.bf16.msra.mxu1 %v1948_v5 }
 0x526   :  { %1280 = vmatprep.subr.bf16.mxu1 %v1953_v54 }
 0x528   :  { %1811 = vmatmul.mubr.bf16.gmra.mrb[56].mxu1 %v2164_v16 }
 0x529   :  { %1814 = vmatprep.mubr.bf16.mxu1 %v2169_v17  ;;  %1281 = vmatpush1.bf16.msra.mxu1 %v1951_v12 }
 0x52a   :  { %1282 = vmatprep.subr.bf16.mxu1 %v1956_v32 }
 0x52d   :  { %1283 = vmatpush1.bf16.msra.mxu1 %v1954_v61 }
 0x52e   :  { %1284 = vmatprep.subr.bf16.mxu1 %v1959_v0 }
 0x530   :  { %1815 = vmatmul.mubr.bf16.gmra.mrb[60].mxu1 %v2185_v21 }
 0x531   :  { %1304 = vmatprep.mubr.bf16.mxu1 %v1965_v1  ;;  %1285 = vmatpush1.bf16.msra.mxu1 %v1957_v35 }
 0x532   :  { %1286 = vmatprep.subr.bf16.mxu1 %v1962_v30 }
 0x535   :  { %1287 = vmatpush1.bf16.msra.mxu1 %v1960_v6 }
 0x5eb   :  { %v1804_v23 = vpop.f32.mrb[48].mxu1 }
 0x5ec   :  { %v1093_v28 = vadd.f32 %v1804_v23, %v2352_v9  ;;  %v1084_v13 = vpop.f32.mrb[49].mxu1 }
 0x5ed   :  { %v1085_v14 = vadd.f32 %v1084_v13, %v2348_v20  ;;  %v1805_v45 = vpop.f32.mrb[50].mxu1 }
 0x5ee   :  { %v1096_v40 = vadd.f32 %v1805_v45, %v2354_v37  ;;  %v1087_v51 = vpop.f32.mrb[51].mxu1  ;;  %v1153_v60 = vadd.f32 %v1150_v8, %v1093_v28 }
 0x5ef   :  { %v1088_v22 = vadd.f32 %v1087_v51, %v2350_v58  ;;  %v1151_v26 = vadd.f32 %v1150_v8, %v1085_v14 }
 0x5f0   :  { %v1154_v56 = vadd.f32 %v1150_v8, %v1096_v40 }
 0x5f1   :  { %v1152_v31 = vadd.f32 %v1150_v8, %v1088_v22 }
 0x5f2   :  { %v1168_v47 = vpack.c.bf16 %v1154_v56, %v1153_v60 }
 0x5f3   :  { %v1167_v55 = vpack.c.bf16 %v1152_v31, %v1151_v26  ;;  %v1808_v27 = vpop.f32.mrb[52].mxu1 }
 0x5f4   :  { %v1109_v9 = vadd.f32 %v1808_v27, %v2360_v24  ;;  %v1100_v50 = vpop.f32.mrb[53].mxu1 }
 0x5f5   :  { %v1101_v39 = vadd.f32 %v1100_v50, %v2356_v25  ;;  %v1809_v41 = vpop.f32.mrb[54].mxu1  ;;  %1305 = vmatmul.mubr.bf16.vlgmr.msra.gmra.mrb[64].mxu1 %v1167_v55 }
 0x5f6   :  { %v1112_v20 = vadd.f32 %v1809_v41, %v2362_v38  ;;  %v1103_v37 = vpop.f32.mrb[55].mxu1  ;;  %1314 = vmatprep.mubr.bf16.mxu1 %v1965_v1  ;;  %v1157_v63 = vadd.f32 %v1150_v8, %v1109_v9 }
 0x5f7   :  { %v1104_v58 = vadd.f32 %v1103_v37, %v2358_v19  ;;  %v1155_v48 = vadd.f32 %v1150_v8, %v1101_v39 }
 0x5f8   :  { %v1158_v44 = vadd.f32 %v1150_v8, %v1112_v20 }
 0x5f9   :  { %v1156_v57 = vadd.f32 %v1150_v8, %v1104_v58 }
 0x5fa   :  { %v1170_v2 = vpack.c.bf16 %v1158_v44, %v1157_v63 }
 0x5fb   :  { %v1812_v42 = vpop.f32.mrb[56].mxu1  ;;  %v1169_v49 = vpack.c.bf16 %v1156_v57, %v1155_v48 }
 0x5fc   :  { %v1125_v24 = vadd.f32 %v1812_v42, %v2368_v36  ;;  %v1116_v7 = vpop.f32.mrb[57].mxu1 }
 0x5fd   :  { %v1117_v25 = vadd.f32 %v1116_v7, %v2364_v52  ;;  %v1813_v53 = vpop.f32.mrb[58].mxu1  ;;  %1315 = vmatmul.mubr.bf16.gmra.mrb[68].mxu1 %v1168_v47 }
 0x5fe   :  { %v1128_v38 = vadd.f32 %v1813_v53, %v2370_v59  ;;  %v1119_v15 = vpop.f32.mrb[59].mxu1  ;;  %1324 = vmatprep.mubr.bf16.mxu1 %v1965_v1  ;;  %v1161_v4 = vadd.f32 %v1150_v8, %v1125_v24 }
 0x5ff   :  { %v1120_v19 = vadd.f32 %v1119_v15, %v2366_v34  ;;  %v1159_v54 = vadd.f32 %v1150_v8, %v1117_v25 }
 0x600   :  { %v1162_v5 = vadd.f32 %v1150_v8, %v1128_v38 }
 0x601   :  { %v1160_v12 = vadd.f32 %v1150_v8, %v1120_v19 }
 0x602   :  { %v1172_v32 = vpack.c.bf16 %v1162_v5, %v1161_v4 }
 0x603   :  { %v1816_v61 = vpop.f32.mrb[60].mxu1  ;;  %v1171_v0 = vpack.c.bf16 %v1160_v12, %v1159_v54  ;;  %v1963_v12 = vld [vmem:[%s2587_s0 + $0x8] sm:$0xff]  }
 0x604   :  { %v1141_v36 = vadd.f32 %v1816_v61, %v2376_v46  ;;  %v1132_v35 = vpop.f32.mrb[61].mxu1  ;;  %v1492_v61 = vsub.s32 3, %v2201_v29 }
 0x605   :  { %v1133_v52 = vadd.f32 %v1132_v35, %v2372_v3  ;;  %v1817_v30 = vpop.f32.mrb[62].mxu1  ;;  %1325 = vmatmul.mubr.bf16.gmra.mrb[72].mxu1 %v1169_v49 }
 0x606   :  { %v1144_v59 = vadd.f32 %v1817_v30, %v2378_v62  ;;  %v1135_v6 = vpop.f32.mrb[63].mxu1  ;;  %1334 = vmatprep.mubr.bf16.mxu1 %v1965_v1  ;;  %v1165_v18 = vadd.f32 %v1150_v8, %v1141_v36 }
 0x607   :  { %v1136_v34 = vadd.f32 %v1135_v6, %v2374_v43  ;;  %v1163_v28 = vadd.f32 %v1150_v8, %v1133_v52 }
 0x608   :  { %v1166_v23 = vadd.f32 %v1150_v8, %v1144_v59 }
 0x609   :  { %v1164_v13 = vadd.f32 %v1150_v8, %v1136_v34 }
 0x60a   :  { %v1174_v14 = vpack.c.bf16 %v1166_v23, %v1165_v18 }
 0x60b   :  { %v1173_v45 = vpack.c.bf16 %v1164_v13, %v1163_v28 }
 0x60d   :  { %1335 = vmatmul.mubr.bf16.gmra.mrb[76].mxu1 %v1170_v2 }
 0x60e   :  { %1344 = vmatprep.mubr.bf16.mxu1 %v1965_v1 }
 0x615   :  { %1345 = vmatmul.mubr.bf16.gmra.mrb[80].mxu1 %v1171_v0  ;;  %v2504_v0 = vrot.slane %v2207_v33, %v1492_v61 }
 0x616   :  { %1354 = vmatprep.mubr.bf16.mxu1 %v1965_v1 }
 0x61d   :  { %1355 = vmatmul.mubr.bf16.gmra.mrb[84].mxu1 %v1172_v32  ;;  %v1964_v32 = vld [vmem:[%s2587_s0 + $0x10] sm:$0xff]  }
 0x61e   :  { %1364 = vmatprep.mubr.bf16.mxu1 %v1965_v1 }
 0x625   :  { %1365 = vmatmul.mubr.bf16.gmra.mrb[88].mxu1 %v1173_v45 }
 0x626   :  { %1374 = vmatprep.mubr.bf16.mxu1 %v1965_v1 }
 0x62d   :  { %1375 = vmatmul.mubr.bf16.gmra.mrb[92].mxu1 %v1174_v14 }
 0x6c8   :  { %v1306_v3 = vpop.f32.mrb[64].mxu1 }
 0x6c9   :  { %v2461_v43 = vpop.f32.mrb[65].mxu1 }
 0x6ca   :  { %v1310_v46 = vpop.f32.mrb[66].mxu1 }
 0x6cb   :  { %v1385_v62 = vpack.c.bf16 %v1310_v46, %v1306_v3  ;;  %v2463_v8 = vpop.f32.mrb[67].mxu1 }
 0x6cd   :  { %1818 = vmatprep.subr.bf16.mxu0 %v1385_v62 }
 0x6ce   :  { %1819 = vmatpush3.bf16.msra.mxu0 %v1385_v62 }
 0x6d0   :  { %v1316_v40 = vpop.f32.mrb[68].mxu1 }
 0x6d1   :  { %v1318_v51 = vpop.f32.mrb[69].mxu1 }
 0x6d2   :  { %v1320_v22 = vpop.f32.mrb[70].mxu1 }
 0x6d3   :  { %v1386_v60 = vpack.c.bf16 %v1320_v22, %v1316_v40  ;;  %v2465_v56 = vpop.f32.mrb[71].mxu1 }
 0x6d5   :  { %1820 = vmatprep.subr.bf16.mxu0 %v1386_v60 }
 0x6d6   :  { %1821 = vmatpush3.bf16.msra.mxu0 %v1386_v60 }
 0x6d8   :  { %v1326_v26 = vpop.f32.mrb[72].mxu1 }
 0x6d9   :  { %v2467_v1 = vpop.f32.mrb[73].mxu1 }
 0x6da   :  { %v1330_v31 = vpop.f32.mrb[74].mxu1 }
 0x6db   :  { %v1387_v47 = vpack.c.bf16 %v1330_v31, %v1326_v26  ;;  %v2469_v55 = vpop.f32.mrb[75].mxu1 }
 0x6dd   :  { %1822 = vmatprep.subr.bf16.mxu0 %v1387_v47 }
 0x6de   :  { %1823 = vmatpush3.bf16.msra.mxu0 %v1387_v47 }
 0x6e0   :  { %v1336_v27 = vpop.f32.mrb[76].mxu1 }
 0x6e1   :  { %v2471_v9 = vpop.f32.mrb[77].mxu1 }
 0x6e2   :  { %v1340_v50 = vpop.f32.mrb[78].mxu1 }
 0x6e3   :  { %v1388_v39 = vpack.c.bf16 %v1340_v50, %v1336_v27  ;;  %v2473_v41 = vpop.f32.mrb[79].mxu1 }
 0x6e5   :  { %1824 = vmatprep.subr.bf16.mxu0 %v1388_v39 }
 0x6e6   :  { %1825 = vmatpush3.bf16.msra.mxu0 %v1388_v39 }
 0x6e8   :  { %v1346_v20 = vpop.f32.mrb[80].mxu1 }
 0x6e9   :  { %v2475_v37 = vpop.f32.mrb[81].mxu1 }
 0x6ea   :  { %v1350_v58 = vpop.f32.mrb[82].mxu1 }
 0x6eb   :  { %v1389_v63 = vpack.c.bf16 %v1350_v58, %v1346_v20  ;;  %v2477_v44 = vpop.f32.mrb[83].mxu1 }
 0x6ed   :  { %1826 = vmatprep.subr.bf16.mxu0 %v1389_v63 }
 0x6ee   :  { %1827 = vmatpush3.bf16.msra.mxu0 %v1389_v63 }
 0x6f0   :  { %v1356_v48 = vpop.f32.mrb[84].mxu1 }
 0x6f1   :  { %v2479_v57 = vpop.f32.mrb[85].mxu1 }
 0x6f2   :  { %v1360_v2 = vpop.f32.mrb[86].mxu1 }
 0x6f3   :  { %v1390_v42 = vpack.c.bf16 %v1360_v2, %v1356_v48  ;;  %v2481_v49 = vpop.f32.mrb[87].mxu1 }
 0x6f5   :  { %1828 = vmatprep.subr.bf16.mxu0 %v1390_v42 }
 0x6f6   :  { %1829 = vmatpush3.bf16.msra.mxu0 %v1390_v42 }
 0x6f8   :  { %v1366_v24 = vpop.f32.mrb[88].mxu1 }
 0x6f9   :  { %v2483_v7 = vpop.f32.mrb[89].mxu1 }
 0x6fa   :  { %v1370_v25 = vpop.f32.mrb[90].mxu1 }
 0x6fb   :  { %v1391_v53 = vpack.c.bf16 %v1370_v25, %v1366_v24  ;;  %v2485_v38 = vpop.f32.mrb[91].mxu1 }
 0x6fd   :  { %1830 = vmatprep.subr.bf16.mxu0 %v1391_v53 }
 0x6fe   :  { %1831 = vmatpush3.bf16.msra.mxu0 %v1391_v53 }
 0x700   :  { %v1376_v15 = vpop.f32.mrb[92].mxu1 }
 0x701   :  { %v2487_v19 = vpop.f32.mrb[93].mxu1 }
 0x702   :  { %v1380_v4 = vpop.f32.mrb[94].mxu1 }
 0x703   :  { %v1392_v5 = vpack.c.bf16 %v1380_v4, %v1376_v15  ;;  %v2489_v54 = vpop.f32.mrb[95].mxu1 }
 0x705   :  { %1832 = vmatprep.subr.bf16.mxu0 %v1392_v5 }
 0x706   :  { %1833 = vmatpush3.bf16.msra.mxu0 %v1392_v5 }
 0x709   :  { %1835 = vmatmul.mubr.bf16.vlgmr.msra.gmra.mrb[80].mxu0 %v1963_v12 }
 0x70a   :  { %1838 = vmatprep.mubr.bf16.mxu0 %v1964_v32 }
 0x711   :  { %1839 = vmatmul.mubr.bf16.gmra.mrb[84].mxu0 %v2140_v10 }
 0x712   :  { %1842 = vmatprep.mubr.bf16.mxu0 %v2145_v11 }
 0x719   :  { %1843 = vmatmul.mubr.bf16.gmra.mrb[88].mxu0 %v2164_v16 }
 0x71a   :  { %1846 = vmatprep.mubr.bf16.mxu0 %v2169_v17 }
 0x721   :  { %1847 = vmatmul.mubr.bf16.gmra.mrb[92].mxu0 %v2185_v21 }
 0x7dc   :  { %v1836_v36 = vpop.f32.mrb[80].mxu0 }
 0x7dd   :  { %v1436_v35 = vadd.f32 %v1836_v36, %v1318_v51  ;;  %v1427_v52 = vpop.f32.mrb[81].mxu0 }
 0x7de   :  { %v1428_v30 = vadd.f32 %v1427_v52, %v2461_v43  ;;  %v1837_v59 = vpop.f32.mrb[82].mxu0 }
 0x7df   :  { %v1496_v10 = vadd.f32 %v2504_v0, %v1436_v35  ;;  %v1439_v11 = vadd.f32 %v1837_v59, %v2465_v56  ;;  %v1430_v16 = vpop.f32.mrb[83].mxu0 }
 0x7e0   :  { %v1494_v17 = vadd.f32 %v2504_v0, %v1428_v30  ;;  %v1431_v21 = vadd.f32 %v1430_v16, %v2463_v8 }
 0x7e1   :  { %1512 = vst [vmem:[%s2589_s4 + $0x10] sm:$0xff] %v1496_v10  ;;  %v1497_v29 = vadd.f32 %v2504_v0, %v1439_v11 }
 0x7e2   :  { %1510 = vst [vmem:[%s2589_s4] sm:$0xff] %v1494_v17  ;;  %v1495_v33 = vadd.f32 %v2504_v0, %v1431_v21 }
 0x7e3   :  { %1513 = vst [vmem:[%s2589_s4 + $0x18] sm:$0xff] %v1497_v29 }
 0x7e4   :  { %1511 = vst [vmem:[%s2589_s4 + $0x8] sm:$0xff] %v1495_v33  ;;  %v1840_v6 = vpop.f32.mrb[84].mxu0 }
 0x7e5   :  { %v1452_v34 = vadd.f32 %v1840_v6, %v2471_v9  ;;  %v1443_v18 = vpop.f32.mrb[85].mxu0 }
 0x7e6   :  { %v1444_v23 = vadd.f32 %v1443_v18, %v2467_v1  ;;  %v1841_v28 = vpop.f32.mrb[86].mxu0 }
 0x7e7   :  { %v1500_v13 = vadd.f32 %v2504_v0, %v1452_v34  ;;  %v1455_v14 = vadd.f32 %v1841_v28, %v2473_v41  ;;  %v1446_v45 = vpop.f32.mrb[87].mxu0 }
 0x7e8   :  { %v1498_v3 = vadd.f32 %v2504_v0, %v1444_v23  ;;  %v1447_v43 = vadd.f32 %v1446_v45, %v2469_v55 }
 0x7e9   :  { %1516 = vst [vmem:[%s2589_s4 + $0x30] sm:$0xff] %v1500_v13  ;;  %v1501_v46 = vadd.f32 %v2504_v0, %v1455_v14 }
 0x7ea   :  { %1514 = vst [vmem:[%s2589_s4 + $0x20] sm:$0xff] %v1498_v3  ;;  %v1499_v62 = vadd.f32 %v2504_v0, %v1447_v43 }
 0x7eb   :  { %1517 = vst [vmem:[%s2589_s4 + $0x38] sm:$0xff] %v1501_v46 }
 0x7ec   :  { %1515 = vst [vmem:[%s2589_s4 + $0x28] sm:$0xff] %v1499_v62  ;;  %v1844_v8 = vpop.f32.mrb[88].mxu0 }
 0x7ed   :  { %v1468_v40 = vadd.f32 %v1844_v8, %v2479_v57  ;;  %v1459_v51 = vpop.f32.mrb[89].mxu0 }
 0x7ee   :  { %v1460_v22 = vadd.f32 %v1459_v51, %v2475_v37  ;;  %v1845_v60 = vpop.f32.mrb[90].mxu0 }
 0x7ef   :  { %v1504_v56 = vadd.f32 %v2504_v0, %v1468_v40  ;;  %v1471_v26 = vadd.f32 %v1845_v60, %v2481_v49  ;;  %v1462_v1 = vpop.f32.mrb[91].mxu0 }
 0x7f0   :  { %v1502_v31 = vadd.f32 %v2504_v0, %v1460_v22  ;;  %v1463_v47 = vadd.f32 %v1462_v1, %v2477_v44 }
 0x7f1   :  { %1520 = vst [vmem:[%s2589_s4 + $0x50] sm:$0xff] %v1504_v56  ;;  %v1505_v55 = vadd.f32 %v2504_v0, %v1471_v26 }
 0x7f2   :  { %1518 = vst [vmem:[%s2589_s4 + $0x40] sm:$0xff] %v1502_v31  ;;  %v1503_v27 = vadd.f32 %v2504_v0, %v1463_v47 }
 0x7f3   :  { %1521 = vst [vmem:[%s2589_s4 + $0x58] sm:$0xff] %v1505_v55 }
 0x7f4   :  { %1519 = vst [vmem:[%s2589_s4 + $0x48] sm:$0xff] %v1503_v27  ;;  %v1848_v9 = vpop.f32.mrb[92].mxu0 }
 0x7f5   :  { %v1484_v50 = vadd.f32 %v1848_v9, %v2487_v19  ;;  %v1475_v39 = vpop.f32.mrb[93].mxu0 }
 0x7f6   :  { %v1476_v41 = vadd.f32 %v1475_v39, %v2483_v7  ;;  %v1849_v20 = vpop.f32.mrb[94].mxu0 }
 0x7f7   :  { %v1508_v37 = vadd.f32 %v2504_v0, %v1484_v50  ;;  %v1487_v58 = vadd.f32 %v1849_v20, %v2489_v54  ;;  %v1478_v63 = vpop.f32.mrb[95].mxu0 }
 0x7f8   :  { %v1506_v44 = vadd.f32 %v2504_v0, %v1476_v41  ;;  %v1479_v48 = vadd.f32 %v1478_v63, %v2485_v38 }
 0x7f9   :  { %1524 = vst [vmem:[%s2589_s4 + $0x70] sm:$0xff] %v1508_v37  ;;  %v1509_v57 = vadd.f32 %v2504_v0, %v1487_v58 }
 0x7fa   :  { %1522 = vst [vmem:[%s2589_s4 + $0x60] sm:$0xff] %v1506_v44  ;;  %v1507_v2 = vadd.f32 %v2504_v0, %v1479_v48 }
 0x7fb   :  { %1525 = vst [vmem:[%s2589_s4 + $0x78] sm:$0xff] %v1509_v57 }
 0x7fc   :  { %1523 = vst [vmem:[%s2589_s4 + $0x68] sm:$0xff] %v1507_v2 }

</bundles_post_ra>
